<compile_context>
chip_gen: v7x
topology: tpu7x:2x2x1
jax: 0.10.0
libtpu: 0.0.40
codegen_flags: <defaults>
</compile_context>

<pallas_src>
import jax
import jax.numpy as jnp
from jax.experimental import pallas as pl
from jax.experimental.pallas import tpu as pltpu


MAX_BATCH_TILE = 8192  # batch lanes per grid step; well under VMEM on v5e/v6e/v7x


def _cdiv(a, b):
    return (a + b - 1) // b


def _round_up(a, m):
    return _cdiv(a, m) * m


def dqn_kernel(x_ref, w1_ref, b1_ref, w2_ref, b2_ref, wm_ref, bm_ref, mean_ref):
    """Fused 2-hidden-layer tanh MLP + linear head, batch on the lane axis.

    x_ref: (S, TB); weights: (out, in); biases: (out, 1) (lane-broadcast).
    All intermediates are (features, TB) so vregs are lane-dense and the single
    (A, TB) output block is written with unmasked dense stores.  MXU
    accumulation, bias adds and tanh are f32 on every generation.
    """
    x = x_ref[...]                                                     # (S, TB)

    # hidden layer 1: tanh(W1 @ x + b1)                                (H1, TB)
    h = jnp.dot(w1_ref[...], x, preferred_element_type=jnp.float32)
    h = jnp.tanh(h + b1_ref[...])

    # hidden layer 2: tanh(W2 @ h + b2)  (cast to weight dtype only for MXU)
    h = jnp.dot(w2_ref[...], h.astype(w2_ref.dtype),
                preferred_element_type=jnp.float32)
    h = jnp.tanh(h + b2_ref[...])                                      # (H2, TB)

    # output head: action_mean = Wm @ h + bm                           (A, TB)
    mean = jnp.dot(wm_ref[...], h.astype(wm_ref.dtype),
                   preferred_element_type=jnp.float32)
    mean_ref[...] = (mean + bm_ref[...]).astype(mean_ref.dtype)


def dqn_forward(x, params, *, use_bf16=True, max_batch_tile=MAX_BATCH_TILE):
    """x: (B, state_dim) f32.  params: weights (out, in), biases (out, 1).

    Returns (action_mean, action_log_std, action_std), matching the PyTorch
    module.  Only action_mean is computed in the Pallas kernel; log_std / std
    are x-independent parameter broadcasts done in plain JAX.

    use_bf16=True (default, v6e/v7x-oriented) casts x and the weight matrices
    to bf16 for the MXU only; this halves the dominant HBM stream but is a
    documented precision tradeoff on x.  Accumulation / bias / tanh stay f32.
    """
    B, S = x.shape
    H1 = params["w1"].shape[0]
    H2 = params["w2"].shape[0]
    A = params["wm"].shape[0]

    mxu_dtype = jnp.bfloat16 if use_bf16 else jnp.float32
    w1 = params["w1"].astype(mxu_dtype)
    w2 = params["w2"].astype(mxu_dtype)
    wm = params["wm"].astype(mxu_dtype)
    b1 = params["b1"].astype(jnp.float32)
    b2 = params["b2"].astype(jnp.float32)
    bm = params["bm"].astype(jnp.float32)

    # Batch on the lane axis: one cheap transpose in the wrapper, no pad copy.
    xt = x.astype(mxu_dtype).T                                         # (S, B)

    # Tile selection: biggest sensible tile to amortize per-step overhead,
    # rounded to the 128-lane width.  If several steps are needed, nudge the
    # step count to be even so the "parallel" batch axis splits evenly across
    # v7x's two TensorCores (no effect on v5e/v6e).
    tb = min(_round_up(B, 128), max_batch_tile)
    steps = _cdiv(B, tb)
    if steps > 1 and steps % 2 == 1:
        tb = _round_up(_cdiv(B, steps + 1), 128)
        steps = _cdiv(B, tb)

    # NOTE on the partial final block: lanes beyond B read garbage, but matmuls
    # contract over feature dims only and all elementwise ops are per-column,
    # so garbage never leaks into valid columns; overhanging output lanes are
    # masked on write and the caller never sees them.

    def const_spec(shape):
        # Constant index_map -> parameter tile stays resident in VMEM across steps.
        return pl.BlockSpec(shape, lambda i: (0, 0))

    def nbytes(a):
        return a.size * a.dtype.itemsize

    cost = pl.CostEstimate(
        flops=2 * B * (S * H1 + H1 * H2 + H2 * A),
        transcendentals=B * (H1 + H2),
        bytes_accessed=(nbytes(xt) + nbytes(w1) + nbytes(w2) + nbytes(wm)
                        + (H1 + H2 + A) * 4 + B * A * 4),
    )

    mean_t = pl.pallas_call(
        dqn_kernel,
        out_shape=jax.ShapeDtypeStruct((A, B), jnp.float32),
        grid=(steps,),
        in_specs=[
            pl.BlockSpec((S, tb), lambda i: (0, i)),   # x.T  (streams on lanes)
            const_spec((H1, S)),                        # W1   (VMEM-resident)
            const_spec((H1, 1)),                        # b1
            const_spec((H2, H1)),                       # W2
            const_spec((H2, 1)),                        # b2
            const_spec((A, H2)),                        # Wm
            const_spec((A, 1)),                         # bm
        ],
        out_specs=pl.BlockSpec((A, tb), lambda i: (0, i)),   # lane-dense output
        compiler_params=pltpu.CompilerParams(
            dimension_semantics=("parallel",)),
        cost_estimate=cost,
    )(xt, w1, b1, w2, b2, wm, bm)

    mean = mean_t.T                                                     # (B, A)

    # x-independent outputs: parameter broadcast ("expand_as") + exp, plain JAX.
    log_std_param = params["log_std"].astype(jnp.float32)               # (1, A)
    action_log_std = jnp.broadcast_to(log_std_param, mean.shape)
    action_std = jnp.broadcast_to(jnp.exp(log_std_param), mean.shape)
    return mean, action_log_std, action_std


def init_params(key, state_dim, hidden_size, action_dim, log_std_init):
    """PyTorch nn.Linear-style init (uniform(-1/sqrt(fan_in), 1/sqrt(fan_in))),
    weights stored (out, in), biases (out, 1); then the DQN-specific scaling:
    action_mean.weight *= 0.1, bias *= 0."""
    keys = jax.random.split(key, 6)

    def linear(kw, kb, fan_in, fan_out):
        bound = 1.0 / jnp.sqrt(fan_in)
        w = jax.random.uniform(kw, (fan_out, fan_in), jnp.float32, -bound, bound)
        b = jax.random.uniform(kb, (fan_out, 1), jnp.float32, -bound, bound)
        return w, b

    h1, h2 = hidden_size
    w1, b1 = linear(keys[0], keys[1], state_dim, h1)
    w2, b2 = linear(keys[2], keys[3], h1, h2)
    wm, bm = linear(keys[4], keys[5], h2, action_dim)
    wm = wm * 0.1          # .weight.data.mul(0.1)
    bm = bm * 0.0          # .bias.data.mul(0)
    log_std = jnp.ones((1, action_dim), jnp.float32) * log_std_init
    return {"w1": w1, "b1": b1, "w2": w2, "b2": b2,
            "wm": wm, "bm": bm, "log_std": log_std}


def reference_forward(x, p):
    h = jnp.tanh(x @ p["w1"].T + p["b1"].T)
    h = jnp.tanh(h @ p["w2"].T + p["b2"].T)
    mean = h @ p["wm"].T + p["bm"].T
    log_std = jnp.broadcast_to(p["log_std"], mean.shape)
    return mean, log_std, jnp.exp(log_std)


if __name__ == "__main__":
    state_dim = 16
    hidden_size = (32, 32)
    action_dim = 8
    log_std_init = -0.5   # the original module uses a global `log_std`; fixed here

    key = jax.random.PRNGKey(0)
    k_x, k_x2, k_p = jax.random.split(key, 3)
    params = init_params(k_p, state_dim, hidden_size, action_dim, log_std_init)

    # --- small-batch check (module-consistent shapes), f32 MXU path ---
    x_small = jax.random.normal(k_x, (2, state_dim), jnp.float32)
    mean, log_std_out, std = dqn_forward(x_small, params, use_bf16=False)
    jax.block_until_ready((mean, log_std_out, std))
    ref_mean, ref_log_std, ref_std = reference_forward(x_small, params)
    assert mean.shape == (2, action_dim)
    assert jnp.allclose(mean, ref_mean, atol=1e-4), "action_mean mismatch (small)"
    assert jnp.allclose(log_std_out, ref_log_std, atol=1e-6), "log_std mismatch"
    assert jnp.allclose(std, ref_std, atol=1e-5), "std mismatch"

    # --- larger batch: exercises lane-tiled grid + partial final block ---
    x_big = jax.random.normal(k_x2, (2500, state_dim), jnp.float32)
    mean_b, log_std_b, std_b = dqn_forward(x_big, params, use_bf16=False)
    jax.block_until_ready((mean_b, log_std_b, std_b))
    ref_mean_b, ref_log_std_b, ref_std_b = reference_forward(x_big, params)
    assert mean_b.shape == (2500, action_dim)
    assert jnp.allclose(mean_b, ref_mean_b, atol=1e-4), "action_mean mismatch (big)"
    assert jnp.allclose(log_std_b, ref_log_std_b, atol=1e-6)
    assert jnp.allclose(std_b, ref_std_b, atol=1e-5)

    # --- default bf16 MXU-operand path (v6e/v7x-oriented), relaxed tolerance ---
    mean_bf, _, _ = dqn_forward(x_big, params)   # use_bf16=True by default
    jax.block_until_ready(mean_bf)
    assert jnp.allclose(mean_bf, ref_mean_b, atol=5e-2), "bf16 action_mean diverged"

    print("KERNEL_OK")
</pallas_src>

<mosaic_0001>
module attributes {stable_mosaic.version = 11 : i64} {
  func.func @dqn_kernel(%arg0: i32, %arg1: memref<16x128xf32, #tpu.memory_space<vmem>>, %arg2: memref<32x16xf32, #tpu.memory_space<vmem>>, %arg3: memref<32x1xf32, #tpu.memory_space<vmem>>, %arg4: memref<32x32xf32, #tpu.memory_space<vmem>>, %arg5: memref<32x1xf32, #tpu.memory_space<vmem>>, %arg6: memref<8x32xf32, #tpu.memory_space<vmem>>, %arg7: memref<8x1xf32, #tpu.memory_space<vmem>>, %arg8: memref<8x128xf32, #tpu.memory_space<vmem>>) attributes {dimension_semantics = [#tpu.dimension_semantics<parallel>], iteration_bounds = array<i64: 1>, scalar_prefetch = 0 : i64, scratch_operands = 0 : i64, tpu.core_type = #tpu.core_type<tc>, window_params = [{transform_indices = @transform_0, window_bounds = array<i64: 16, 128>}, {pipeline_mode = #tpu.pipeline_mode<synchronous>, transform_indices = @transform_1, window_bounds = array<i64: 32, 16>}, {pipeline_mode = #tpu.pipeline_mode<synchronous>, transform_indices = @transform_2, window_bounds = array<i64: 32, 1>}, {pipeline_mode = #tpu.pipeline_mode<synchronous>, transform_indices = @transform_3, window_bounds = array<i64: 32, 32>}, {pipeline_mode = #tpu.pipeline_mode<synchronous>, transform_indices = @transform_4, window_bounds = array<i64: 32, 1>}, {pipeline_mode = #tpu.pipeline_mode<synchronous>, transform_indices = @transform_5, window_bounds = array<i64: 8, 32>}, {pipeline_mode = #tpu.pipeline_mode<synchronous>, transform_indices = @transform_6, window_bounds = array<i64: 8, 1>}, {transform_indices = @transform_7, window_bounds = array<i64: 8, 128>}]} {
    %c0 = arith.constant 0 : index
    %c0_0 = arith.constant 0 : index
    %0 = vector.load %arg1[%c0, %c0_0] : memref<16x128xf32, #tpu.memory_space<vmem>>, vector<16x128xf32>
    %c0_1 = arith.constant 0 : index
    %c0_2 = arith.constant 0 : index
    %1 = vector.load %arg2[%c0_1, %c0_2] : memref<32x16xf32, #tpu.memory_space<vmem>>, vector<32x16xf32>
    %cst = arith.constant dense<0.000000e+00> : vector<32x128xf32>
    %2 = tpu.matmul %1, %0, %cst {dimension_numbers = #tpu.dot_dimension_numbers<[1], [0], [0], [1], [0, 0, 1, 1], [], []>} : vector<32x16xf32>, vector<16x128xf32>, vector<32x128xf32> -> vector<32x128xf32>
    %c0_3 = arith.constant 0 : index
    %c0_4 = arith.constant 0 : index
    %3 = vector.load %arg3[%c0_3, %c0_4] : memref<32x1xf32, #tpu.memory_space<vmem>>, vector<32x1xf32>
    %4 = vector.broadcast %3 : vector<32x1xf32> to vector<32x128xf32>
    %5 = arith.addf %2, %4 : vector<32x128xf32>
    %6 = math.tanh %5 : vector<32x128xf32>
    %c0_5 = arith.constant 0 : index
    %c0_6 = arith.constant 0 : index
    %7 = vector.load %arg4[%c0_5, %c0_6] : memref<32x32xf32, #tpu.memory_space<vmem>>, vector<32x32xf32>
    %cst_7 = arith.constant dense<0.000000e+00> : vector<32x128xf32>
    %8 = tpu.matmul %7, %6, %cst_7 {dimension_numbers = #tpu.dot_dimension_numbers<[1], [0], [0], [1], [0, 0, 1, 1], [], []>} : vector<32x32xf32>, vector<32x128xf32>, vector<32x128xf32> -> vector<32x128xf32>
    %c0_8 = arith.constant 0 : index
    %c0_9 = arith.constant 0 : index
    %9 = vector.load %arg5[%c0_8, %c0_9] : memref<32x1xf32, #tpu.memory_space<vmem>>, vector<32x1xf32>
    %10 = vector.broadcast %9 : vector<32x1xf32> to vector<32x128xf32>
    %11 = arith.addf %8, %10 : vector<32x128xf32>
    %12 = math.tanh %11 : vector<32x128xf32>
    %c0_10 = arith.constant 0 : index
    %c0_11 = arith.constant 0 : index
    %13 = vector.load %arg6[%c0_10, %c0_11] : memref<8x32xf32, #tpu.memory_space<vmem>>, vector<8x32xf32>
    %cst_12 = arith.constant dense<0.000000e+00> : vector<8x128xf32>
    %14 = tpu.matmul %13, %12, %cst_12 {dimension_numbers = #tpu.dot_dimension_numbers<[1], [0], [0], [1], [0, 0, 1, 1], [], []>} : vector<8x32xf32>, vector<32x128xf32>, vector<8x128xf32> -> vector<8x128xf32>
    %c0_13 = arith.constant 0 : index
    %c0_14 = arith.constant 0 : index
    %15 = vector.load %arg7[%c0_13, %c0_14] : memref<8x1xf32, #tpu.memory_space<vmem>>, vector<8x1xf32>
    %16 = vector.broadcast %15 : vector<8x1xf32> to vector<8x128xf32>
    %17 = arith.addf %14, %16 : vector<8x128xf32>
    %c0_15 = arith.constant 0 : index
    %c0_16 = arith.constant 0 : index
    %18 = vector.load %arg8[%c0_15, %c0_16] : memref<8x128xf32, #tpu.memory_space<vmem>>, vector<8x128xf32>
    tpu.vector_store %arg8[%c0_15, %c0_16], %17 {strides = array<i32>} : memref<8x128xf32, #tpu.memory_space<vmem>>, vector<8x128xf32>,
    return
  }
  func.func @transform_0(%arg0: i32) -> (i32, i32) {
    %c0_i32 = arith.constant 0 : i32
    %c0_i32_0 = arith.constant 0 : i32
    return %c0_i32, %arg0 : i32, i32
  }
  func.func @transform_1(%arg0: i32) -> (i32, i32) {
    %c0_i32 = arith.constant 0 : i32
    %c0_i32_0 = arith.constant 0 : i32
    %c0_i32_1 = arith.constant 0 : i32
    return %c0_i32, %c0_i32_0 : i32, i32
  }
  func.func @transform_2(%arg0: i32) -> (i32, i32) {
    %c0_i32 = arith.constant 0 : i32
    %c0_i32_0 = arith.constant 0 : i32
    %c0_i32_1 = arith.constant 0 : i32
    return %c0_i32, %c0_i32_0 : i32, i32
  }
  func.func @transform_3(%arg0: i32) -> (i32, i32) {
    %c0_i32 = arith.constant 0 : i32
    %c0_i32_0 = arith.constant 0 : i32
    %c0_i32_1 = arith.constant 0 : i32
    return %c0_i32, %c0_i32_0 : i32, i32
  }
  func.func @transform_4(%arg0: i32) -> (i32, i32) {
    %c0_i32 = arith.constant 0 : i32
    %c0_i32_0 = arith.constant 0 : i32
    %c0_i32_1 = arith.constant 0 : i32
    return %c0_i32, %c0_i32_0 : i32, i32
  }
  func.func @transform_5(%arg0: i32) -> (i32, i32) {
    %c0_i32 = arith.constant 0 : i32
    %c0_i32_0 = arith.constant 0 : i32
    %c0_i32_1 = arith.constant 0 : i32
    return %c0_i32, %c0_i32_0 : i32, i32
  }
  func.func @transform_6(%arg0: i32) -> (i32, i32) {
    %c0_i32 = arith.constant 0 : i32
    %c0_i32_0 = arith.constant 0 : i32
    %c0_i32_1 = arith.constant 0 : i32
    return %c0_i32, %c0_i32_0 : i32, i32
  }
  func.func @transform_7(%arg0: i32) -> (i32, i32) {
    %c0_i32 = arith.constant 0 : i32
    %c0_i32_0 = arith.constant 0 : i32
    return %c0_i32, %arg0 : i32, i32
  }
}

</mosaic_0001>

<bundles_post_ra>
// kernel: tpu_custom_call.1
= control target key start
LH: loop header
LB: loop body
LE: loop exit
PB: predicated region body
PF: predicated region fallthrough
CT: control target
= control target key end

     0   :  { %vm56_vm0 = vcmask 130048   ;;  %v476_v3 = vmov 0   ;;  %vm186_vm1 = vcmask 261120   ;;  %v477_v39 = vmov 0.0|0.0   ;;  %s592_s0 = inlined_call_operand.vmem [shape: f32[16,2], index: 0, kind: input, shape index: {}]   ;;  %s593_s1 = inlined_call_operand.vmem [shape: f32[32,16], index: 1, kind: input, shape index: {}]   ;;  %s594_s2 = inlined_call_operand.vmem [shape: f32[32,1], index: 2, kind: input, shape index: {}]   ;;  %s595_s4 = inlined_call_operand.vmem [shape: f32[32,1], index: 4, kind: input, shape index: {}]   ;;  %s596_s6 = inlined_call_operand.vmem [shape: f32[8,1], index: 6, kind: input, shape index: {}]   ;;  %s597_s3 = inlined_call_operand.vmem [shape: f32[32,32], index: 3, kind: input, shape index: {}]   ;;  %s598_s5 = inlined_call_operand.vmem [shape: f32[8,32], index: 5, kind: input, shape index: {}]   ;;  %s599_s7 = inlined_call_operand.vmem [shape: f32[8,2], index: 7, kind: output, shape index: {}]  }
   0x1   :  { %v26_v0 = vld [vmem:[%s592_s0] sm:$0xff]  ;;  %v27_v1 = vld [vmem:[%s592_s0 + $0x8] sm:$0xff]  ;;  %458 = vset.pattern.permute.xlu0 %v476_v3  ;;  %459 = vset.pattern.permute.xlu1 %v476_v3  ;;  %v34_v6 = vld [vmem:[%s594_s2 + $0x10] sm:$0xff]  ;;  %vm478_vm2 = vmmov 0   ;;  %v479_v40 = vmov 0.0  }
   0x2   :  { %v28_v2 = vld [vmem:[%s593_s1] sm:$0xff]  ;;  %v436_v4 = vpack.c.bf16 %v27_v1, %v26_v0  ;;  %v29_v7 = vld [vmem:[%s593_s1 + $0x8] sm:$0xff]  ;;  %48 = vperm.xlu1 %459, %v34_v6   ;;  %v30_v9 = vld [vmem:[%s593_s1 + $0x10] sm:$0xff] }
   0x3   :  { %405 = vmatprep.mubr.msk.f32.mxu0 %vm56_vm0, %v28_v2  ;;  %v32_v5 = vld [vmem:[%s594_s2] sm:$0xff]  ;;  %v33_v8 = vld [vmem:[%s594_s2 + $0x8] sm:$0xff]  ;;  %v35_v10 = vld [vmem:[%s594_s2 + $0x18] sm:$0xff] }
   0x4   :  { %437 = vmatprep.subr.bf16.mxu0 %v436_v4  ;;  %38 = vperm.xlu0 %458, %v32_v5   ;;  %v31_v11 = vld [vmem:[%s593_s1 + $0x18] sm:$0xff]  ;;  %v162_v12 = vld [vmem:[%s595_s4] sm:$0xff]  ;;  %v163_v13 = vld [vmem:[%s595_s4 + $0x8] sm:$0xff] }
   0x5   :  { %439 = vmatpush3.bf16.msra.mxu0 %v436_v4  ;;  %v164_v14 = vld [vmem:[%s595_s4 + $0x10] sm:$0xff]  ;;  %v165_v15 = vld [vmem:[%s595_s4 + $0x18] sm:$0xff]  ;;  %v289_v16 = vld [vmem:[%s596_s6] sm:$0xff] }
   0x6   :  { %53 = vperm.xlu1 %459, %v35_v10   ;;  %v158_v17 = vld [vmem:[%s597_s3] sm:$0xff]  ;;  %v159_v36 = vld [vmem:[%s597_s3 + $0x8] sm:$0xff]  ;;  %v160_v37 = vld [vmem:[%s597_s3 + $0x10] sm:$0xff]  ;;  %448 = vmatprep.subr.bf16.mxu0 %v477_v39 }
   0x7   :  { %419 = vmatprep.mubr.msk.f32.mxu1 %vm186_vm1, %v158_v17  ;;  %v161_v38 = vld [vmem:[%s597_s3 + $0x18] sm:$0xff]  ;;  %v288_v59 = vld [vmem:[%s598_s5] sm:$0xff] }
   0x8   :  { %406 = vmatmul.mubr.msk.f32.vlgmr.msra.gmra.mrb[0].mxu0 %vm56_vm0, %v29_v7  ;;  %43 = vperm.xlu0 %458, %v33_v8  }
   0x9   :  { %408 = vmatprep.mubr.msk.f32.mxu0 %vm56_vm0, %v30_v9 }
   0xa   :  { %173 = vperm.xlu1 %459, %v163_v13  }
   0xc   :  { %409 = vmatmul.mubr.msk.f32.gmra.mrb[2].mxu0 %vm56_vm0, %v31_v11  ;;  %168 = vperm.xlu0 %458, %v162_v12  }
   0xd   :  { %433 = vmatprep.mubr.msk.f32.mxu0 %vm478_vm2, %v479_v40 }
   0xe   :  { %183 = vperm.xlu1 %459, %v165_v15  }
  0x10   :  { %178 = vperm.xlu0 %458, %v164_v14  }
  0x14   :  { %292 = vperm.xlu0 %458, %v289_v16  }
  0x81   :  { %v49_v19 = vpop.permute.xlu1 %48 }
  0x83   :  { %v39_v18 = vpop.permute.xlu0 %38 }
  0x85   :  { %v54_v25 = vpop.permute.xlu1 %53 }
  0x87   :  { %v44_v20 = vpop.permute.xlu0 %43 }
  0x89   :  { %v174_v41 = vpop.permute.xlu1 %173 }
  0x8b   :  { %v169_v42 = vpop.permute.xlu0 %168 }
  0x8d   :  { %v184_v47 = vpop.permute.xlu1 %183 }
  0x8f   :  { %v179_v49 = vpop.permute.xlu0 %178 }
  0x93   :  { %v293_v60 = vpop.permute.xlu0 %292 }
  0xdb   :  { %v407_v21 = vpop.f32.mrb[0].mxu0 }
  0xdc   :  { %v141_v22 = vadd.f32 %v407_v21, %v44_v20  ;;  %v135_v23 = vpop.f32.mrb[1].mxu0 }
  0xdd   :  { %v136_v24 = vadd.f32 %v135_v23, %v39_v18 }
  0xde   :  { %460 = vtanh.f32 %v141_v22 }
  0xdf   :  { %462 = vtanh.f32 %v136_v24  ;;  %v410_v26 = vpop.f32.mrb[2].mxu0 }
  0xe0   :  { %v151_v27 = vadd.f32 %v410_v26, %v54_v25  ;;  %v145_v28 = vpop.f32.mrb[3].mxu0 }
  0xe1   :  { %v146_v29 = vadd.f32 %v145_v28, %v49_v19 }
  0xe2   :  { %464 = vtanh.f32 %v151_v27 }
  0xe3   :  { %466 = vtanh.f32 %v146_v29 }
  0xe8   :  { %v461_v30 = vpop.eup %460 }
  0xe9   :  { %v463_v31 = vpop.eup %462 }
  0xea   :  { %v440_v32 = vpack.c.bf16 %v461_v30, %v463_v31 }
  0xec   :  { %v465_v33 = vpop.eup %464  ;;  %441 = vmatprep.subr.bf16.mxu1 %v440_v32 }
  0xed   :  { %v467_v34 = vpop.eup %466  ;;  %443 = vmatpush3.bf16.msra.mxu1 %v440_v32 }
  0xee   :  { %v444_v35 = vpack.c.bf16 %v465_v33, %v467_v34 }
  0xf0   :  { %445 = vmatprep.subr.bf16.mxu1 %v444_v35 }
  0xf1   :  { %447 = vmatpush3.bf16.msra.mxu1 %v444_v35 }
  0xf4   :  { %420 = vmatmul.mubr.msk.f32.vlgmr.msra.gmra.mrb[0].mxu1 %vm186_vm1, %v159_v36 }
  0xf5   :  { %422 = vmatprep.mubr.msk.f32.mxu1 %vm186_vm1, %v160_v37 }
  0xf8   :  { %423 = vmatmul.mubr.msk.f32.gmra.mrb[2].mxu1 %vm186_vm1, %v161_v38 }
 0x1c7   :  { %v421_v43 = vpop.f32.mrb[0].mxu1 }
 0x1c8   :  { %v271_v44 = vadd.f32 %v421_v43, %v174_v41  ;;  %v265_v45 = vpop.f32.mrb[1].mxu1 }
 0x1c9   :  { %v266_v46 = vadd.f32 %v265_v45, %v169_v42 }
 0x1ca   :  { %468 = vtanh.f32 %v271_v44 }
 0x1cb   :  { %470 = vtanh.f32 %v266_v46  ;;  %v424_v48 = vpop.f32.mrb[2].mxu1 }
 0x1cc   :  { %v281_v50 = vadd.f32 %v424_v48, %v184_v47  ;;  %v275_v51 = vpop.f32.mrb[3].mxu1 }
 0x1cd   :  { %v276_v52 = vadd.f32 %v275_v51, %v179_v49 }
 0x1ce   :  { %472 = vtanh.f32 %v281_v50 }
 0x1cf   :  { %474 = vtanh.f32 %v276_v52 }
 0x1d4   :  { %v469_v53 = vpop.eup %468 }
 0x1d5   :  { %v471_v54 = vpop.eup %470 }
 0x1d6   :  { %v449_v55 = vpack.c.bf16 %v469_v53, %v471_v54 }
 0x1d8   :  { %v473_v56 = vpop.eup %472  ;;  %450 = vmatpush3.bf16.msra.mxu0 %v449_v55 }
 0x1d9   :  { %v475_v57 = vpop.eup %474  ;;  %451 = vmatprep.subr.bf16.mxu0 %v477_v39 }
 0x1da   :  { %v452_v58 = vpack.c.bf16 %v473_v56, %v475_v57 }
 0x1dc   :  { %453 = vmatpush3.bf16.msra.mxu0 %v452_v58 }
 0x1df   :  { %434 = vmatmul.mubr.msk.f32.vlgmr.msra.gmra.mrb[4].mxu0 %vm186_vm1, %v288_v59 }
 0x2b2   :  { %v364_v61 = vpop.f32.mrb[4].mxu0 }
 0x2b3   :  { %v365_v62 = vadd.f32 %v364_v61, %v293_v60  ;;  %v435_v63 = vpop.f32.mrb[5].mxu0 }
 0x2b5   :  { %368 = vst [vmem:[%s599_s7] sm:$0xff] %v365_v62 }

</bundles_post_ra>
